<compile_context>
chip_gen: v6e
topology: v6e:2x2x1
jax: 0.10.0
libtpu: 0.0.40
codegen_flags: <defaults>
</compile_context>

<pallas_src>
import functools

import jax
import jax.numpy as jnp
from jax.experimental import pallas as pl
from jax.experimental.pallas import tpu as pltpu


def _cdiv(a, b):
    return -(-a // b)


def _round_up(x, m):
    return ((x + m - 1) // m) * m


# ----------------------------------------------------------------------------
# Fused cell compute (fc1 + relu, fused & gate-padded GRU, fc2).
# Weights arrive as loaded arrays (f32 or bf16); biases f32; accumulation and
# gate nonlinearities stay f32.  Gate g occupies lanes [g*GP, g*GP+H).
# ----------------------------------------------------------------------------
def _rnn_cell(obs, h, w1, b1, wi, bi, wh, bhn, w2, b2, H, GP):
    cdt = w1.dtype

    # fc1 + relu
    x = jnp.dot(obs.astype(cdt), w1, preferred_element_type=jnp.float32) + b1
    x = jnp.maximum(x, 0.0)

    # Fused GRU gates (128-aligned gate groups):
    #   gi = x @ [W_ir|W_iz|W_in] + (b_i with b_hr/b_hz folded in)
    #   gh = h @ [W_hr|W_hz|W_hn]
    gi = jnp.dot(x.astype(cdt), wi, preferred_element_type=jnp.float32) + bi
    gh = jnp.dot(h.astype(cdt), wh, preferred_element_type=jnp.float32)

    r = jax.nn.sigmoid(gi[:, 0:GP] + gh[:, 0:GP])
    z = jax.nn.sigmoid(gi[:, GP:2 * GP] + gh[:, GP:2 * GP])
    n = jnp.tanh(gi[:, 2 * GP:3 * GP] + r * (gh[:, 2 * GP:3 * GP] + bhn))

    z_h = z[:, :H]          # offset-0 narrowing slices (cheap)
    n_h = n[:, :H]
    h_new = (1.0 - z_h) * n_h + z_h * h

    # fc2 (action columns padded to a 128-lane multiple host-side)
    q = jnp.dot(h_new.astype(cdt), w2, preferred_element_type=jnp.float32) + b2
    return q, h_new


# ----------------------------------------------------------------------------
# Single-step kernel (matches the PyTorch module's forward signature).
# ----------------------------------------------------------------------------
def rnn_step_kernel(H, GP, obs_ref, h_ref, w1_ref, b1_ref, wi_ref, bi_ref,
                    wh_ref, bhn_ref, w2_ref, b2_ref, q_ref, h_out_ref):
    q, h_new = _rnn_cell(
        obs_ref[...], h_ref[...],
        w1_ref[...], b1_ref[...], wi_ref[...], bi_ref[...],
        wh_ref[...], bhn_ref[...], w2_ref[...], b2_ref[...], H, GP)
    q_ref[...] = q.astype(q_ref.dtype)
    h_out_ref[...] = h_new.astype(h_out_ref.dtype)


def _tile_batch(B, tile_b):
    """Balanced batch tiling: minimal padding; >=2 tiles for large B so the
    'parallel' grid axis can be sharded across v7x's two TensorCores."""
    num_tiles = _cdiv(B, tile_b)
    if num_tiles == 1 and B >= 512:
        num_tiles = 2
    tile = max(8, _round_up(_cdiv(B, num_tiles), 8))
    num_tiles = _cdiv(B, tile)
    return tile, num_tiles, num_tiles * tile


def rnn_forward(obs, hidden_state, params, *, tile_b=2048):
    """obs: [..., input_shape]; hidden_state: [..., H] (reshaped to [-1, H]).

    Returns (q [B, n_actions], h [B, H]).  For per-step RL acting with tiny B
    prefer rnn_forward_sequence (amortizes launch/DMA overhead over T steps).
    """
    H = params["hidden_dim"]
    GP = params["gate_pad"]
    A = params["n_actions"]
    A_pad = params["w2"].shape[1]
    in_dim = params["w1"].shape[0]
    cdt = params["w1"].dtype

    obs = obs.reshape(-1, in_dim).astype(cdt)      # cast once (bf16 path)
    h_in = hidden_state.reshape(-1, H).astype(jnp.float32)
    B = obs.shape[0]

    TILE_B, num_tiles, B_pad = _tile_batch(B, tile_b)
    if B_pad != B:
        obs = jnp.pad(obs, ((0, B_pad - B), (0, 0)))
        h_in = jnp.pad(h_in, ((0, B_pad - B), (0, 0)))

    const = lambda i: (0, 0)   # weights / biases stay resident in VMEM
    q, h = pl.pallas_call(
        functools.partial(rnn_step_kernel, H, GP),
        out_shape=(
            jax.ShapeDtypeStruct((B_pad, A_pad), jnp.float32),
            jax.ShapeDtypeStruct((B_pad, H), jnp.float32),
        ),
        grid=(num_tiles,),
        in_specs=[
            pl.BlockSpec((TILE_B, in_dim), lambda i: (i, 0)),   # obs
            pl.BlockSpec((TILE_B, H), lambda i: (i, 0)),        # h_in
            pl.BlockSpec(params["w1"].shape, const),
            pl.BlockSpec(params["b1"].shape, const),
            pl.BlockSpec(params["w_i"].shape, const),
            pl.BlockSpec(params["b_i"].shape, const),
            pl.BlockSpec(params["w_h"].shape, const),
            pl.BlockSpec(params["b_hn"].shape, const),
            pl.BlockSpec(params["w2"].shape, const),
            pl.BlockSpec(params["b2"].shape, const),
        ],
        out_specs=(
            pl.BlockSpec((TILE_B, A_pad), lambda i: (i, 0)),    # lane-dense q
            pl.BlockSpec((TILE_B, H), lambda i: (i, 0)),
        ),
        compiler_params=pltpu.CompilerParams(
            dimension_semantics=("parallel",),
            vmem_limit_bytes=48 * 1024 * 1024),
    )(obs, h_in,
      params["w1"], params["b1"], params["w_i"], params["b_i"],
      params["w_h"], params["b_hn"], params["w2"], params["b2"])

    return q[:B, :A], h[:B]


# ----------------------------------------------------------------------------
# Multi-timestep kernel: whole rollout in one pallas_call, time axis chunked.
# grid = (batch_tiles, T_chunks); h is carried in the resident h_out block.
# q for a chunk is packed into a lane-dense (TILE_B, T_CHUNK*A) slab.
# ----------------------------------------------------------------------------
def rnn_seq_kernel(H, GP, A, T_CHUNK, T, T_pad,
                   obs_ref, h0_ref, w1_ref, b1_ref, wi_ref, bi_ref, wh_ref,
                   bhn_ref, w2_ref, b2_ref, q_ref, h_out_ref):
    c = pl.program_id(1)

    # Seed the resident carry block from the initial hidden state at chunk 0.
    @pl.when(c == 0)
    def _():
        h_out_ref[...] = h0_ref[...]

    # Hoist weight/bias loads (and their broadcasts) out of the time loop.
    w1, b1 = w1_ref[...], b1_ref[...]
    wi, bi = wi_ref[...], bi_ref[...]
    wh, bhn = wh_ref[...], bhn_ref[...]
    w2, b2 = w2_ref[...], b2_ref[...]

    h = h_out_ref[...]                      # f32 carry, lives in VMEM across c
    for s in range(T_CHUNK):                # small static trip count
        obs = obs_ref[s]                    # (TILE_B, in_dim)
        q, h_new = _rnn_cell(obs, h, w1, b1, wi, bi, wh, bhn, w2, b2, H, GP)
        if T_pad != T:
            # Freeze the carry on padded (past-the-end) time steps.
            valid = (c * T_CHUNK + s) < T
            h_new = jnp.where(valid, h_new, h)
        h = h_new
        # Pack this step's real action columns into the chunk slab.
        q_ref[0, :, s * A:(s + 1) * A] = q[:, :A].astype(q_ref.dtype)
    h_out_ref[...] = h


def rnn_forward_sequence(obs_seq, hidden_state, params, *, tile_b=2048,
                         t_chunk=16):
    """obs_seq: [T, B, input_shape]; hidden_state: [..., H].

    Returns (q_seq [T, B, n_actions], h_final [B, H]).  One pallas_call for the
    whole rollout: weights DMA'd once per batch tile, per-step grid overhead
    amortized over t_chunk steps, h carried in VMEM.
    """
    T, B, in_dim = obs_seq.shape
    H = params["hidden_dim"]
    GP = params["gate_pad"]
    A = params["n_actions"]
    cdt = params["w1"].dtype

    h0 = hidden_state.reshape(-1, H).astype(jnp.float32)
    obs_seq = obs_seq.astype(cdt)           # cast once (bf16 path halves DMA)

    TILE_B, num_tiles, B_pad = _tile_batch(B, tile_b)
    num_chunks = _cdiv(T, max(1, min(t_chunk, T)))
    T_CHUNK = _cdiv(T, num_chunks)          # balanced chunks (minimal padding)
    T_pad = num_chunks * T_CHUNK

    if B_pad != B or T_pad != T:
        obs_seq = jnp.pad(obs_seq, ((0, T_pad - T), (0, B_pad - B), (0, 0)))
    if B_pad != B:
        h0 = jnp.pad(h0, ((0, B_pad - B), (0, 0)))

    slab_w = T_CHUNK * A
    const = lambda i, c: (0, 0)
    q_slab, h_final = pl.pallas_call(
        functools.partial(rnn_seq_kernel, H, GP, A, T_CHUNK, T, T_pad),
        out_shape=(
            jax.ShapeDtypeStruct((num_chunks, B_pad, slab_w), jnp.float32),
            jax.ShapeDtypeStruct((B_pad, H), jnp.float32),
        ),
        grid=(num_tiles, num_chunks),
        in_specs=[
            pl.BlockSpec((T_CHUNK, TILE_B, in_dim), lambda i, c: (c, i, 0)),
            pl.BlockSpec((TILE_B, H), lambda i, c: (i, 0)),     # h0
            pl.BlockSpec(params["w1"].shape, const),
            pl.BlockSpec(params["b1"].shape, const),
            pl.BlockSpec(params["w_i"].shape, const),
            pl.BlockSpec(params["b_i"].shape, const),
            pl.BlockSpec(params["w_h"].shape, const),
            pl.BlockSpec(params["b_hn"].shape, const),
            pl.BlockSpec(params["w2"].shape, const),
            pl.BlockSpec(params["b2"].shape, const),
        ],
        out_specs=(
            pl.BlockSpec((1, TILE_B, slab_w), lambda i, c: (c, i, 0)),  # q slab
            pl.BlockSpec((TILE_B, H), lambda i, c: (i, 0)),             # h carry
        ),
        compiler_params=pltpu.CompilerParams(
            dimension_semantics=("parallel", "arbitrary"),
            vmem_limit_bytes=48 * 1024 * 1024),
    )(obs_seq, h0,
      params["w1"], params["b1"], params["w_i"], params["b_i"],
      params["w_h"], params["b_hn"], params["w2"], params["b2"])

    # Unpack the slab: [c, b, s*A + a] -> [t, b, a]
    q_seq = q_slab.reshape(num_chunks, B_pad, T_CHUNK, A)
    q_seq = q_seq.transpose(0, 2, 1, 3).reshape(T_pad, B_pad, A)
    return q_seq[:T, :B], h_final[:B]


# ----------------------------------------------------------------------------
# Parameter init (PyTorch-style uniform) with host-side gate fusion, 128-lane
# gate-group padding and lane-dense fc2 padding.  dtype=jnp.bfloat16 gives
# MXU-native matmul inputs on all generations (biases / gate math stay f32).
# ----------------------------------------------------------------------------
def init_params(key, input_shape, n_actions, rnn_hidden_dim,
                dtype=jnp.float32):
    H = rnn_hidden_dim
    GP = _round_up(H, 128)            # per-gate 128-lane-aligned group
    A = n_actions
    A_pad = _round_up(A, 128)
    ks = jax.random.split(key, 8)

    def u(k, shape, fan_in):
        bound = 1.0 / jnp.sqrt(jnp.float32(fan_in))
        return jax.random.uniform(k, shape, jnp.float32, -bound, bound)

    # fc1: Linear(input_shape -> H)
    w1 = u(ks[0], (input_shape, H), input_shape)
    b1 = u(ks[1], (H,), input_shape)

    # GRUCell(H, H) — PyTorch layout: weight_ih/weight_hh (3H, H), gates r,z,n.
    w_ih = u(ks[2], (3 * H, H), H)
    w_hh = u(ks[3], (3 * H, H), H)
    b_ih = u(ks[4], (3 * H,), H)
    b_hh = u(ks[5], (3 * H,), H)

    # fc2: Linear(H -> n_actions)
    w2 = u(ks[6], (H, A), H)
    b2 = u(ks[7], (A,), H)

    def pad_cols(m, width):
        return jnp.pad(m, ((0, 0), (0, width - m.shape[1])))

    def pad_vec(v, width):
        return jnp.pad(v, (0, width - v.shape[0]))

    # Fused + gate-group-padded GRU weights: lanes [g*GP, g*GP+H) hold gate g.
    w_i = jnp.concatenate(
        [pad_cols(w_ih[g * H:(g + 1) * H].T, GP) for g in range(3)], axis=1)
    w_h = jnp.concatenate(
        [pad_cols(w_hh[g * H:(g + 1) * H].T, GP) for g in range(3)], axis=1)
    # Fold r/z hidden biases into the input biases (always summed); b_hn stays
    # separate (it sits under r * gh_n).
    b_i = jnp.concatenate([
        pad_vec(b_ih[0:H] + b_hh[0:H], GP),
        pad_vec(b_ih[H:2 * H] + b_hh[H:2 * H], GP),
        pad_vec(b_ih[2 * H:3 * H], GP),
    ]).reshape(1, 3 * GP)
    b_hn = pad_vec(b_hh[2 * H:3 * H], GP).reshape(1, GP)

    return dict(
        w1=w1.astype(dtype), b1=b1.reshape(1, H),
        w_i=w_i.astype(dtype), b_i=b_i,
        w_h=w_h.astype(dtype), b_hn=b_hn,
        w2=pad_cols(w2, A_pad).astype(dtype),
        b2=pad_vec(b2, A_pad).reshape(1, A_pad),
        hidden_dim=H, n_actions=A, gate_pad=GP,
        # Raw PyTorch-layout f32 tensors, used only by the pure-JAX reference.
        raw=dict(w1=w1, b1=b1, w_ih=w_ih, w_hh=w_hh, b_ih=b_ih, b_hh=b_hh,
                 w2=w2, b2=b2),
    )


# ----------------------------------------------------------------------------
# Pure-JAX references (exact PyTorch GRUCell formula) for verification.
# ----------------------------------------------------------------------------
def rnn_forward_ref(obs, hidden_state, params):
    raw = params["raw"]
    H = params["hidden_dim"]
    h = hidden_state.reshape(-1, H).astype(jnp.float32)
    obs = obs.reshape(-1, raw["w1"].shape[0]).astype(jnp.float32)
    x = jnp.maximum(obs @ raw["w1"] + raw["b1"], 0.0)
    gi = x @ raw["w_ih"].T + raw["b_ih"]
    gh = h @ raw["w_hh"].T + raw["b_hh"]
    r = jax.nn.sigmoid(gi[:, :H] + gh[:, :H])
    z = jax.nn.sigmoid(gi[:, H:2 * H] + gh[:, H:2 * H])
    n = jnp.tanh(gi[:, 2 * H:] + r * gh[:, 2 * H:])
    h_new = (1.0 - z) * n + z * h
    q = h_new @ raw["w2"] + raw["b2"]
    return q, h_new


def rnn_forward_sequence_ref(obs_seq, hidden_state, params):
    def step(h, o):
        q, h_new = rnn_forward_ref(o, h, params)
        return h_new, q
    h_final, q_seq = jax.lax.scan(step, hidden_state.reshape(-1, params["hidden_dim"]),
                                  obs_seq)
    return q_seq, h_final


if __name__ == "__main__":
    input_shape = 16
    n_actions = 8
    rnn_hidden_dim = 32
    batch = 8
    T = 6

    key = jax.random.PRNGKey(0)
    k_obs, k_h, k_params, k_seq, k_seq2, k_obs2, k_h2 = jax.random.split(key, 7)

    obs = jax.random.normal(k_obs, (batch, input_shape), jnp.float32)
    hidden_state = jax.random.normal(k_h, (batch, rnn_hidden_dim), jnp.float32)
    obs_seq = jax.random.normal(k_seq, (T, batch, input_shape), jnp.float32)
    params = init_params(k_params, input_shape, n_actions, rnn_hidden_dim)

    # References (exact PyTorch semantics).
    q_ref, h_ref = rnn_forward_ref(obs, hidden_state, params)
    q_seq_ref, h_T_ref = rnn_forward_sequence_ref(obs_seq, hidden_state, params)

    # --- single-step kernel
    q, h = rnn_forward(obs, hidden_state, params)
    jax.block_until_ready((q, h))
    assert q.shape == (batch, n_actions) and h.shape == (batch, rnn_hidden_dim)
    assert jnp.allclose(q, q_ref, atol=1e-5, rtol=1e-5)
    assert jnp.allclose(h, h_ref, atol=1e-5, rtol=1e-5)

    # --- single-step kernel with a batch that needs padding (B=10)
    obs_b = jax.random.normal(k_obs2, (10, input_shape), jnp.float32)
    h_b = jax.random.normal(k_h2, (10, rnn_hidden_dim), jnp.float32)
    qb_ref, hb_ref = rnn_forward_ref(obs_b, h_b, params)
    qb, hb = rnn_forward(obs_b, h_b, params)
    jax.block_until_ready((qb, hb))
    assert jnp.allclose(qb, qb_ref, atol=1e-5, rtol=1e-5)
    assert jnp.allclose(hb, hb_ref, atol=1e-5, rtol=1e-5)

    # --- whole-rollout kernel (single time chunk)
    q_seq, h_T = rnn_forward_sequence(obs_seq, hidden_state, params)
    jax.block_until_ready((q_seq, h_T))
    assert jnp.allclose(q_seq, q_seq_ref, atol=1e-4, rtol=1e-4)
    assert jnp.allclose(h_T, h_T_ref, atol=1e-4, rtol=1e-4)

    # --- rollout with multiple chunks + time padding/masking (T=7, t_chunk=4)
    T2 = 7
    obs_seq2 = jax.random.normal(k_seq2, (T2, batch, input_shape), jnp.float32)
    q_seq2_ref, h_T2_ref = rnn_forward_sequence_ref(obs_seq2, hidden_state, params)
    q_seq2, h_T2 = rnn_forward_sequence(obs_seq2, hidden_state, params, t_chunk=4)
    jax.block_until_ready((q_seq2, h_T2))
    assert jnp.allclose(q_seq2, q_seq2_ref, atol=1e-4, rtol=1e-4)
    assert jnp.allclose(h_T2, h_T2_ref, atol=1e-4, rtol=1e-4)

    # --- bf16 weight path (MXU-native; f32 accumulation + gate math)
    params_bf16 = init_params(k_params, input_shape, n_actions,
                              rnn_hidden_dim, dtype=jnp.bfloat16)
    q_bf, h_bf = rnn_forward(obs, hidden_state, params_bf16)
    jax.block_until_ready((q_bf, h_bf))
    assert jnp.max(jnp.abs(q_bf - q_ref)) < 1e-1
    assert jnp.max(jnp.abs(h_bf - h_ref)) < 1e-1

    q_seq_bf, h_T_bf = rnn_forward_sequence(obs_seq, hidden_state, params_bf16)
    jax.block_until_ready((q_seq_bf, h_T_bf))
    assert jnp.max(jnp.abs(q_seq_bf - q_seq_ref)) < 2e-1
    assert jnp.max(jnp.abs(h_T_bf - h_T_ref)) < 2e-1

    print("KERNEL_OK")
</pallas_src>

<mosaic_0001>
module attributes {stable_mosaic.version = 11 : i64} {
  func.func @rnn_step_kernel(%arg0: i32, %arg1: memref<8x16xf32, #tpu.memory_space<vmem>>, %arg2: memref<8x32xf32, #tpu.memory_space<vmem>>, %arg3: memref<16x32xf32, #tpu.memory_space<vmem>>, %arg4: memref<1x32xf32, #tpu.memory_space<vmem>>, %arg5: memref<32x384xf32, #tpu.memory_space<vmem>>, %arg6: memref<1x384xf32, #tpu.memory_space<vmem>>, %arg7: memref<32x384xf32, #tpu.memory_space<vmem>>, %arg8: memref<1x128xf32, #tpu.memory_space<vmem>>, %arg9: memref<32x128xf32, #tpu.memory_space<vmem>>, %arg10: memref<1x128xf32, #tpu.memory_space<vmem>>, %arg11: memref<8x128xf32, #tpu.memory_space<vmem>>, %arg12: memref<8x32xf32, #tpu.memory_space<vmem>>) attributes {dimension_semantics = [#tpu.dimension_semantics<parallel>], iteration_bounds = array<i64: 1>, scalar_prefetch = 0 : i64, scratch_operands = 0 : i64, tpu.core_type = #tpu.core_type<tc>, window_params = [{transform_indices = @transform_0, window_bounds = array<i64: 8, 16>}, {transform_indices = @transform_1, window_bounds = array<i64: 8, 32>}, {pipeline_mode = #tpu.pipeline_mode<synchronous>, transform_indices = @transform_2, window_bounds = array<i64: 16, 32>}, {pipeline_mode = #tpu.pipeline_mode<synchronous>, transform_indices = @transform_3, window_bounds = array<i64: 1, 32>}, {pipeline_mode = #tpu.pipeline_mode<synchronous>, transform_indices = @transform_4, window_bounds = array<i64: 32, 384>}, {pipeline_mode = #tpu.pipeline_mode<synchronous>, transform_indices = @transform_5, window_bounds = array<i64: 1, 384>}, {pipeline_mode = #tpu.pipeline_mode<synchronous>, transform_indices = @transform_6, window_bounds = array<i64: 32, 384>}, {pipeline_mode = #tpu.pipeline_mode<synchronous>, transform_indices = @transform_7, window_bounds = array<i64: 1, 128>}, {pipeline_mode = #tpu.pipeline_mode<synchronous>, transform_indices = @transform_8, window_bounds = array<i64: 32, 128>}, {pipeline_mode = #tpu.pipeline_mode<synchronous>, transform_indices = @transform_9, window_bounds = array<i64: 1, 128>}, {transform_indices = @transform_10, window_bounds = array<i64: 8, 128>}, {transform_indices = @transform_11, window_bounds = array<i64: 8, 32>}]} {
    %c0 = arith.constant 0 : index
    %c0_0 = arith.constant 0 : index
    %0 = vector.load %arg1[%c0, %c0_0] : memref<8x16xf32, #tpu.memory_space<vmem>>, vector<8x16xf32>
    %c0_1 = arith.constant 0 : index
    %c0_2 = arith.constant 0 : index
    %1 = vector.load %arg2[%c0_1, %c0_2] : memref<8x32xf32, #tpu.memory_space<vmem>>, vector<8x32xf32>
    %c0_3 = arith.constant 0 : index
    %c0_4 = arith.constant 0 : index
    %2 = vector.load %arg3[%c0_3, %c0_4] : memref<16x32xf32, #tpu.memory_space<vmem>>, vector<16x32xf32>
    %c0_5 = arith.constant 0 : index
    %c0_6 = arith.constant 0 : index
    %3 = vector.load %arg4[%c0_5, %c0_6] : memref<1x32xf32, #tpu.memory_space<vmem>>, vector<1x32xf32>
    %c0_7 = arith.constant 0 : index
    %c0_8 = arith.constant 0 : index
    %4 = vector.load %arg5[%c0_7, %c0_8] : memref<32x384xf32, #tpu.memory_space<vmem>>, vector<32x384xf32>
    %c0_9 = arith.constant 0 : index
    %c0_10 = arith.constant 0 : index
    %5 = vector.load %arg6[%c0_9, %c0_10] : memref<1x384xf32, #tpu.memory_space<vmem>>, vector<1x384xf32>
    %c0_11 = arith.constant 0 : index
    %c0_12 = arith.constant 0 : index
    %6 = vector.load %arg7[%c0_11, %c0_12] : memref<32x384xf32, #tpu.memory_space<vmem>>, vector<32x384xf32>
    %c0_13 = arith.constant 0 : index
    %c0_14 = arith.constant 0 : index
    %7 = vector.load %arg8[%c0_13, %c0_14] : memref<1x128xf32, #tpu.memory_space<vmem>>, vector<1x128xf32>
    %c0_15 = arith.constant 0 : index
    %c0_16 = arith.constant 0 : index
    %8 = vector.load %arg9[%c0_15, %c0_16] : memref<32x128xf32, #tpu.memory_space<vmem>>, vector<32x128xf32>
    %c0_17 = arith.constant 0 : index
    %c0_18 = arith.constant 0 : index
    %9 = vector.load %arg10[%c0_17, %c0_18] : memref<1x128xf32, #tpu.memory_space<vmem>>, vector<1x128xf32>
    %cst = arith.constant dense<0.000000e+00> : vector<8x32xf32>
    %10 = tpu.matmul %0, %2, %cst {dimension_numbers = #tpu.dot_dimension_numbers<[1], [0], [0], [1], [0, 0, 1, 1], [], []>} : vector<8x16xf32>, vector<16x32xf32>, vector<8x32xf32> -> vector<8x32xf32>
    %11 = vector.broadcast %3 : vector<1x32xf32> to vector<8x32xf32>
    %12 = arith.addf %10, %11 : vector<8x32xf32>
    %cst_19 = arith.constant 0.000000e+00 : f32
    %13 = vector.broadcast %cst_19 : f32 to vector<8x32xf32>
    %14 = arith.maximumf %12, %13 : vector<8x32xf32>
    %cst_20 = arith.constant dense<0.000000e+00> : vector<8x384xf32>
    %15 = tpu.matmul %14, %4, %cst_20 {dimension_numbers = #tpu.dot_dimension_numbers<[1], [0], [0], [1], [0, 0, 1, 1], [], []>} : vector<8x32xf32>, vector<32x384xf32>, vector<8x384xf32> -> vector<8x384xf32>
    %16 = vector.broadcast %5 : vector<1x384xf32> to vector<8x384xf32>
    %17 = arith.addf %15, %16 : vector<8x384xf32>
    %cst_21 = arith.constant dense<0.000000e+00> : vector<8x384xf32>
    %18 = tpu.matmul %1, %6, %cst_21 {dimension_numbers = #tpu.dot_dimension_numbers<[1], [0], [0], [1], [0, 0, 1, 1], [], []>} : vector<8x32xf32>, vector<32x384xf32>, vector<8x384xf32> -> vector<8x384xf32>
    %19 = vector.extract_strided_slice %17 {offsets = [0, 0], sizes = [8, 128], strides = [1, 1]} : vector<8x384xf32> to vector<8x128xf32>
    %20 = vector.extract_strided_slice %18 {offsets = [0, 0], sizes = [8, 128], strides = [1, 1]} : vector<8x384xf32> to vector<8x128xf32>
    %21 = arith.addf %19, %20 : vector<8x128xf32>
    %22 = arith.negf %21 : vector<8x128xf32>
    %23 = math.exp %22 : vector<8x128xf32>
    %cst_22 = arith.constant 1.000000e+00 : f32
    %24 = vector.broadcast %cst_22 : f32 to vector<8x128xf32>
    %25 = arith.addf %24, %23 : vector<8x128xf32>
    %26 = arith.divf %24, %25 : vector<8x128xf32>
    %27 = vector.extract_strided_slice %17 {offsets = [0, 128], sizes = [8, 128], strides = [1, 1]} : vector<8x384xf32> to vector<8x128xf32>
    %28 = vector.extract_strided_slice %18 {offsets = [0, 128], sizes = [8, 128], strides = [1, 1]} : vector<8x384xf32> to vector<8x128xf32>
    %29 = arith.addf %27, %28 : vector<8x128xf32>
    %30 = arith.negf %29 : vector<8x128xf32>
    %31 = math.exp %30 : vector<8x128xf32>
    %cst_23 = arith.constant 1.000000e+00 : f32
    %32 = vector.broadcast %cst_23 : f32 to vector<8x128xf32>
    %33 = arith.addf %32, %31 : vector<8x128xf32>
    %34 = arith.divf %32, %33 : vector<8x128xf32>
    %35 = vector.extract_strided_slice %17 {offsets = [0, 256], sizes = [8, 128], strides = [1, 1]} : vector<8x384xf32> to vector<8x128xf32>
    %36 = vector.extract_strided_slice %18 {offsets = [0, 256], sizes = [8, 128], strides = [1, 1]} : vector<8x384xf32> to vector<8x128xf32>
    %37 = vector.broadcast %7 : vector<1x128xf32> to vector<8x128xf32>
    %38 = arith.addf %36, %37 : vector<8x128xf32>
    %39 = arith.mulf %26, %38 : vector<8x128xf32>
    %40 = arith.addf %35, %39 : vector<8x128xf32>
    %41 = math.tanh %40 : vector<8x128xf32>
    %42 = vector.extract_strided_slice %34 {offsets = [0, 0], sizes = [8, 32], strides = [1, 1]} : vector<8x128xf32> to vector<8x32xf32>
    %43 = vector.extract_strided_slice %41 {offsets = [0, 0], sizes = [8, 32], strides = [1, 1]} : vector<8x128xf32> to vector<8x32xf32>
    %cst_24 = arith.constant 1.000000e+00 : f32
    %44 = vector.broadcast %cst_24 : f32 to vector<8x32xf32>
    %45 = arith.subf %44, %42 : vector<8x32xf32>
    %46 = arith.mulf %45, %43 : vector<8x32xf32>
    %47 = arith.mulf %42, %1 : vector<8x32xf32>
    %48 = arith.addf %46, %47 : vector<8x32xf32>
    %cst_25 = arith.constant dense<0.000000e+00> : vector<8x128xf32>
    %49 = tpu.matmul %48, %8, %cst_25 {dimension_numbers = #tpu.dot_dimension_numbers<[1], [0], [0], [1], [0, 0, 1, 1], [], []>} : vector<8x32xf32>, vector<32x128xf32>, vector<8x128xf32> -> vector<8x128xf32>
    %50 = vector.broadcast %9 : vector<1x128xf32> to vector<8x128xf32>
    %51 = arith.addf %49, %50 : vector<8x128xf32>
    %c0_26 = arith.constant 0 : index
    %c0_27 = arith.constant 0 : index
    %52 = vector.load %arg11[%c0_26, %c0_27] : memref<8x128xf32, #tpu.memory_space<vmem>>, vector<8x128xf32>
    tpu.vector_store %arg11[%c0_26, %c0_27], %51 {strides = array<i32>} : memref<8x128xf32, #tpu.memory_space<vmem>>, vector<8x128xf32>,
    %c0_28 = arith.constant 0 : index
    %c0_29 = arith.constant 0 : index
    %53 = vector.load %arg12[%c0_28, %c0_29] : memref<8x32xf32, #tpu.memory_space<vmem>>, vector<8x32xf32>
    tpu.vector_store %arg12[%c0_28, %c0_29], %48 {strides = array<i32>} : memref<8x32xf32, #tpu.memory_space<vmem>>, vector<8x32xf32>,
    return
  }
  func.func @transform_0(%arg0: i32) -> (i32, i32) {
    %c0_i32 = arith.constant 0 : i32
    %c0_i32_0 = arith.constant 0 : i32
    return %arg0, %c0_i32 : i32, i32
  }
  func.func @transform_1(%arg0: i32) -> (i32, i32) {
    %c0_i32 = arith.constant 0 : i32
    %c0_i32_0 = arith.constant 0 : i32
    return %arg0, %c0_i32 : i32, i32
  }
  func.func @transform_2(%arg0: i32) -> (i32, i32) {
    %c0_i32 = arith.constant 0 : i32
    %c0_i32_0 = arith.constant 0 : i32
    %c0_i32_1 = arith.constant 0 : i32
    return %c0_i32, %c0_i32_0 : i32, i32
  }
  func.func @transform_3(%arg0: i32) -> (i32, i32) {
    %c0_i32 = arith.constant 0 : i32
    %c0_i32_0 = arith.constant 0 : i32
    %c0_i32_1 = arith.constant 0 : i32
    return %c0_i32, %c0_i32_0 : i32, i32
  }
  func.func @transform_4(%arg0: i32) -> (i32, i32) {
    %c0_i32 = arith.constant 0 : i32
    %c0_i32_0 = arith.constant 0 : i32
    %c0_i32_1 = arith.constant 0 : i32
    return %c0_i32, %c0_i32_0 : i32, i32
  }
  func.func @transform_5(%arg0: i32) -> (i32, i32) {
    %c0_i32 = arith.constant 0 : i32
    %c0_i32_0 = arith.constant 0 : i32
    %c0_i32_1 = arith.constant 0 : i32
    return %c0_i32, %c0_i32_0 : i32, i32
  }
  func.func @transform_6(%arg0: i32) -> (i32, i32) {
    %c0_i32 = arith.constant 0 : i32
    %c0_i32_0 = arith.constant 0 : i32
    %c0_i32_1 = arith.constant 0 : i32
    return %c0_i32, %c0_i32_0 : i32, i32
  }
  func.func @transform_7(%arg0: i32) -> (i32, i32) {
    %c0_i32 = arith.constant 0 : i32
    %c0_i32_0 = arith.constant 0 : i32
    %c0_i32_1 = arith.constant 0 : i32
    return %c0_i32, %c0_i32_0 : i32, i32
  }
  func.func @transform_8(%arg0: i32) -> (i32, i32) {
    %c0_i32 = arith.constant 0 : i32
    %c0_i32_0 = arith.constant 0 : i32
    %c0_i32_1 = arith.constant 0 : i32
    return %c0_i32, %c0_i32_0 : i32, i32
  }
  func.func @transform_9(%arg0: i32) -> (i32, i32) {
    %c0_i32 = arith.constant 0 : i32
    %c0_i32_0 = arith.constant 0 : i32
    %c0_i32_1 = arith.constant 0 : i32
    return %c0_i32, %c0_i32_0 : i32, i32
  }
  func.func @transform_10(%arg0: i32) -> (i32, i32) {
    %c0_i32 = arith.constant 0 : i32
    %c0_i32_0 = arith.constant 0 : i32
    return %arg0, %c0_i32 : i32, i32
  }
  func.func @transform_11(%arg0: i32) -> (i32, i32) {
    %c0_i32 = arith.constant 0 : i32
    %c0_i32_0 = arith.constant 0 : i32
    return %arg0, %c0_i32 : i32, i32
  }
}

</mosaic_0001>

<bundles_post_ra>
// kernel: tpu_custom_call.1
= control target key start
LH: loop header
LB: loop body
LE: loop exit
PB: predicated region body
PF: predicated region fallthrough
CT: control target
= control target key end

     0   :  { %17 = vsyncpa [#allocation3], 0  ;;  %s1096_s0 = inlined_call_operand.hbm [shape: f32[8,16], index: 0, kind: input, shape index: {}]   ;;  %s1097_s1 = inlined_call_operand.hbm [shape: f32[8,32], index: 1, kind: input, shape index: {}]   ;;  %s1098_s2 = inlined_call_operand.hbm [shape: f32[16,32], index: 2, kind: input, shape index: {}]   ;;  %s1099_s3 = inlined_call_operand.vmem [shape: f32[1,32], index: 3, kind: input, shape index: {}]   ;;  %s1100_s4 = inlined_call_operand.hbm [shape: f32[32,384], index: 4, kind: input, shape index: {}]   ;;  %s1101_s5 = inlined_call_operand.vmem [shape: f32[1,384], index: 5, kind: input, shape index: {}]   ;;  %s1102_s6 = inlined_call_operand.hbm [shape: f32[32,384], index: 6, kind: input, shape index: {}]   ;;  %s1103_s7 = inlined_call_operand.vmem [shape: f32[1,128], index: 7, kind: input, shape index: {}]   ;;  %s1104_s8 = inlined_call_operand.hbm [shape: f32[32,128], index: 8, kind: input, shape index: {}]   ;;  %s1105_s9 = inlined_call_operand.vmem [shape: f32[1,128], index: 9, kind: input, shape index: {}]   ;;  %s1106_s10 = inlined_call_operand.hbm [shape: f32[8,128], index: 10, kind: output, shape index: {0}]   ;;  %s1107_s11 = inlined_call_operand.hbm [shape: f32[8,32], index: 11, kind: output, shape index: {1}]  }
   0x1   :  { %18 = vsyncpa [#allocation6], 0 }
   0x2   :  { %19 = vsyncpa [#allocation9], 0 }
   0x3   :  { %20 = vsyncpa [#allocation12], 0 }
   0x4   :  { %21 = vsyncpa [#allocation4], 0 }
   0x5   :  { %22 = vsyncpa [#allocation15], 0  ;;  %s945_s17 = smov [#allocation5]   ;;  %s946_s19 = smov [#allocation8]  }
   0x6   :  { %s39_s18 = sshll.u32 %s945_s17, 4  ;;  %s62_s20 = sshll.u32 %s946_s19, 4  ;;  %s40_s18 = int_to_ptr.vmem [resolvable:$true] %s39_s18  ;;  %s63_s20 = int_to_ptr.vmem [resolvable:$true] %s62_s20 }
   0x7   :  { %s781_s21 = scalar_lea.vmem %s40_s18, 128  ;;  %p786_p1 = scmp.lt.s32.totalorder %s40_s18, %s40_s18 }
   0x8   :  { %p782_p0 = scmp.ne.s32.totalorder %s40_s18, %s781_s21  ;;  %p787_p2 = scmp.lt.s32.totalorder %s781_s21, %s781_s21 }
   0xa   :  { %p788_p3 = por %p787_p2, %p786_p1 }
   0xc   :  { %p789_p4 = pnand %p788_p3, %p782_p0 }
   0xe   :  { %792 = shalt.err (!%p789_p4)
}
   0xf   :  { %42 = dma.hbm_to_vmem [thread:$0]  %s1097_s1, 128, %s40_s18, [#allocation6]  }
  0x10   :  { %s801_s24 = scalar_lea.vmem %s63_s20, 1536  ;;  %p806_p6 = scmp.lt.s32.totalorder %s63_s20, %s63_s20 }
  0x11   :  { %p802_p5 = scmp.ne.s32.totalorder %s63_s20, %s801_s24  ;;  %p807_p7 = scmp.lt.s32.totalorder %s801_s24, %s801_s24 }
  0x13   :  { %p808_p8 = por %p807_p7, %p806_p6 }
  0x15   :  { %p809_p9 = pnand %p808_p8, %p802_p5 }
  0x17   :  { %812 = shalt.err (!%p809_p9)
}
  0x18   :  { %s947_s25 = smov 384   ;;  %s948_s26 = smov 24  }
  0x19   :  { %68 = dma.hbm_to_vmem [thread:$0]  %s1100_s4, 1536, %s63_s20, [#allocation9], %s947_s25, %s947_s25, %s948_s26  }
  0x1a   :  { %s949_s29 = smov [#allocation2]   ;;  %s950_s12 = smov [#allocation7]  }
  0x1b   :  { %s29_s30 = sshll.u32 %s949_s29, 4  ;;  %s48_s1 = sshll.u32 %s950_s12, 4  ;;  %s30_s30 = int_to_ptr.vmem [resolvable:$true] %s29_s30  ;;  %s49_s1 = int_to_ptr.vmem [resolvable:$true] %s48_s1 }
  0x1c   :  { %s821_s13 = scalar_lea.vmem %s30_s30, 128  ;;  %p826_p11 = scmp.lt.s32.totalorder %s30_s30, %s30_s30 }
  0x1d   :  { %p822_p10 = scmp.ne.s32.totalorder %s30_s30, %s821_s13  ;;  %p827_p12 = scmp.lt.s32.totalorder %s821_s13, %s821_s13 }
  0x1f   :  { %p828_p13 = por %p827_p12, %p826_p11 }
  0x21   :  { %p829_p0 = pnand %p828_p13, %p822_p10 }
  0x23   :  { %832 = shalt.err (!%p829_p0)
}
  0x24   :  { %32 = dma.hbm_to_vmem [thread:$0]  %s1096_s0, 128, %s30_s30, [#allocation3]  }
  0x25   :  { %s841_s16 = scalar_lea.vmem %s49_s1, 256  ;;  %p846_p2 = scmp.lt.s32.totalorder %s49_s1, %s49_s1 }
  0x26   :  { %p842_p1 = scmp.ne.s32.totalorder %s49_s1, %s841_s16  ;;  %p847_p3 = scmp.lt.s32.totalorder %s841_s16, %s841_s16 }
  0x28   :  { %p848_p4 = por %p847_p3, %p846_p2 }
  0x2a   :  { %p849_p5 = pnand %p848_p4, %p842_p1 }
  0x2c   :  { %852 = shalt.err (!%p849_p5)
}
  0x2d   :  { %s951_s4 = smov 128   ;;  %s952_s17 = smov 8  }
  0x2e   :  { %54 = dma.hbm_to_vmem [thread:$0]  %s1098_s2, 256, %s49_s1, [#allocation6], %s951_s4, %s951_s4, %s952_s17  }
  0x2f   :  { %s953_s20 = smov [#allocation10]   ;;  %s954_s22 = smov [#allocation11]  }
  0x30   :  { %s76_s21 = sshll.u32 %s953_s20, 4  ;;  %s90_s23 = sshll.u32 %s954_s22, 4  ;;  %s77_s21 = int_to_ptr.vmem [resolvable:$true] %s76_s21  ;;  %s91_s23 = int_to_ptr.vmem [resolvable:$true] %s90_s23 }
  0x31   :  { %s861_s0 = scalar_lea.vmem %s77_s21, 1536  ;;  %p866_p7 = scmp.lt.s32.totalorder %s77_s21, %s77_s21 }
  0x32   :  { %p862_p6 = scmp.ne.s32.totalorder %s77_s21, %s861_s0  ;;  %p867_p8 = scmp.lt.s32.totalorder %s861_s0, %s861_s0 }
  0x34   :  { %p868_p9 = por %p867_p8, %p866_p7 }
  0x36   :  { %p869_p10 = pnand %p868_p9, %p862_p6 }
  0x38   :  { %872 = shalt.err (!%p869_p10)
}
  0x39   :  { %82 = dma.hbm_to_vmem [thread:$0]  %s1102_s6, 1536, %s77_s21, [#allocation9], %s947_s25, %s947_s25, %s948_s26  }
  0x3a   :  { %s881_s2 = scalar_lea.vmem %s91_s23, 512  ;;  %p886_p12 = scmp.lt.s32.totalorder %s91_s23, %s91_s23 }
  0x3b   :  { %p882_p11 = scmp.ne.s32.totalorder %s91_s23, %s881_s2  ;;  %p887_p13 = scmp.lt.s32.totalorder %s881_s2, %s881_s2 }
  0x3d   :  { %p888_p0 = por %p887_p13, %p886_p12 }
  0x3f   :  { %p889_p1 = pnand %p888_p0, %p882_p11 }
  0x41   :  { %892 = shalt.err (!%p889_p1)
}
  0x42   :  { %96 = dma.hbm_to_vmem [thread:$0]  %s1104_s8, 512, %s91_s23, [#allocation12], %s951_s4, %s951_s4, %s952_s17  }
  0x43   :  { %933 = dma.done.wait [#allocation3], 128  }
  0x44   :  { %934 = vsyncadd [#allocation3], 4294967168 }
  0x45   :  { %935 = dma.done.wait [#allocation6], 384  }
  0x46   :  { %936 = vsyncadd [#allocation6], 4294966912 }
  0x47   :  { %937 = dma.done.wait [#allocation9], 3072  }
  0x48   :  { %938 = vsyncadd [#allocation9], 4294964224 }
  0x49   :  { %939 = dma.done.wait [#allocation12], 512  }
  0x4a   :  { %940 = vsyncadd [#allocation12], 4294966784  ;;  %v955_v0 = vmov 0.0   ;;  %vm956_vm0 = vmmov 0   ;;  %v120_v1 = vld [vmem:[#allocation7 + $0x8] sm:$0xff]  ;;  %v119_v2 = vld [vmem:[#allocation7] sm:$0xff]  ;;  %v235_v38 = vlaneseq }
  0x4b   :  { %709 = vmatprep.subr.mxu0 %v955_v0  ;;  %713 = vmatprep.mubr.msk.f32.mxu0 %vm956_vm0, %v955_v0  ;;  %v117_v3 = vld [vmem:[#allocation2] sm:$0xff]  ;;  %vm159_vm1 = vcmask 130048   ;;  %v132_v4 = vld [vmem:[#allocation8 + $0x50] sm:$0xff]  ;;  %v131_v5 = vld [vmem:[#allocation8 + $0x48] sm:$0xff]  ;;  %vm250_vm2 = vcmask 261120  }
  0x4c   :  { %318 = vmatprep.mubr.f32.mxu1 %v955_v0  ;;  %710 = vmatpush3.msra.mxu0 %v120_v1  ;;  %v129_v6 = vld [vmem:[#allocation8 + $0x38] sm:$0xff]  ;;  %v128_v8 = vld [vmem:[#allocation8 + $0x30] sm:$0xff]  ;;  %v126_v9 = vld [vmem:[#allocation8 + $0x20] sm:$0xff]  ;;  %v236_v39 = vshrl.u32 %v235_v38, 7 }
  0x4d   :  { %711 = vmatprep.subr.mxu0 %v955_v0  ;;  %278 = vmatprep.subr.mxu1 %v132_v4  ;;  %v133_v7 = vld [vmem:[#allocation8 + $0x58] sm:$0xff]  ;;  %v130_v10 = vld [vmem:[#allocation8 + $0x40] sm:$0xff]  ;;  %v123_v12 = vld [vmem:[#allocation8 + $0x8] sm:$0xff] }
  0x4e   :  { %712 = vmatpush3.msra.mxu0 %v119_v2  ;;  %279 = vmatpush1.msra.mxu1 %v131_v5  ;;  %v125_v11 = vld [vmem:[#allocation8 + $0x18] sm:$0xff]  ;;  %v127_v13 = vld [vmem:[#allocation8 + $0x28] sm:$0xff]  ;;  %v122_v14 = vld [vmem:[#allocation8] sm:$0xff]  ;;  %v237_v40 = vsub.s32 0, %v236_v39  ;;  %v241_v46 = vsub.s32 1, %v236_v39  ;;  %v245_v61 = vsub.s32 2, %v236_v39 }
  0x4f   :  { %714 = vmatmul.mubr.msk.f32.vlgmr.msra.gmra.mxu0 %vm159_vm1, %v117_v3  ;;  %716 = vmatprep.subr.mxu0 %v955_v0  ;;  %v124_v15 = vld [vmem:[#allocation8 + $0x10] sm:$0xff]  ;;  %v680_v17 = vld [vmem:[%s1099_s3] ss:$0 sm:$0xff]  ;;  %v144_v22 = vld [vmem:[#allocation10 + $0x48] sm:$0xff] }
  0x50   :  { %280 = vmatprep.subr.mxu1 %v129_v6  ;;  %717 = vmatpush3.msra.mxu0 %v133_v7  ;;  %v145_v16 = vld [vmem:[#allocation10 + $0x50] sm:$0xff]  ;;  %v142_v23 = vld [vmem:[#allocation10 + $0x38] sm:$0xff]  ;;  %v139_v26 = vld [vmem:[#allocation10 + $0x20] sm:$0xff] }
  0x51   :  { %281 = vmatpush1.msra.mxu1 %v128_v8  ;;  %718 = vmatprep.subr.mxu0 %v955_v0  ;;  %v146_v24 = vld [vmem:[#allocation10 + $0x58] sm:$0xff]  ;;  %v141_v25 = vld [vmem:[#allocation10 + $0x30] sm:$0xff]  ;;  %v143_v27 = vld [vmem:[#allocation10 + $0x40] sm:$0xff] }
  0x52   :  { %724 = vmatprep.mubr.msk.f32.mxu0 %vm956_vm0, %v955_v0  ;;  %282 = vmatprep.subr.mxu1 %v126_v9  ;;  %v138_v28 = vld [vmem:[#allocation10 + $0x18] sm:$0xff]  ;;  %v136_v29 = vld [vmem:[#allocation10 + $0x8] sm:$0xff]  ;;  %v135_v31 = vld [vmem:[#allocation10] sm:$0xff] }
  0x53   :  { %719 = vmatpush3.msra.mxu0 %v130_v10  ;;  %283 = vmatpush1.msra.mxu1 %v125_v11  ;;  %v140_v30 = vld [vmem:[#allocation10 + $0x28] sm:$0xff]  ;;  %v137_v33 = vld [vmem:[#allocation10 + $0x10] sm:$0xff]  ;;  %v151_v34 = vld [vmem:[#allocation11 + $0x18] sm:$0xff] }
  0x54   :  { %720 = vmatprep.subr.mxu0 %v955_v0  ;;  %284 = vmatprep.subr.mxu1 %v123_v12  ;;  %v1062_v32 = vld [vmem:[#allocation5] sm:$0xff]  ;;  %v150_v35 = vld [vmem:[#allocation11 + $0x10] sm:$0xff]  ;;  %v148_v37 = vld [vmem:[#allocation11] sm:$0xff] }
  0x55   :  { %721 = vmatpush3.msra.mxu0 %v127_v13  ;;  %285 = vmatpush1.msra.mxu1 %v122_v14  ;;  %v149_v36 = vld [vmem:[#allocation11 + $0x8] sm:$0xff]  ;;  %v134_v41 = vld [vmem:[%s1101_s5] sm:$0x7] }
  0x56   :  { %722 = vmatprep.subr.mxu0 %v955_v0  ;;  %422 = vmatprep.subr.mxu1 %v145_v16  ;;  %v238_v45 = vrot.slane %v134_v41, %v237_v40  ;;  %v242_v50 = vrot.slane %v134_v41, %v241_v46  ;;  %v688_v63 = vld [vmem:[%s1103_s7] ss:$0 sm:$0xff]  ;;  %s957_s7 = smov [#allocation14]  }
  0x57   :  { %723 = vmatpush3.msra.mxu0 %v124_v15  ;;  %s664_s30 = sshll.u32 %s957_s7, 4  ;;  %s665_s30 = int_to_ptr.vmem [resolvable:$true] %s664_s30 }
  0x58   :  { %727 = vmatprep.subr.mxu0 %v955_v0  ;;  %s893_s12 = scalar_lea.vmem %s665_s30, 128  ;;  %p898_p3 = scmp.lt.s32.totalorder %s665_s30, %s665_s30 }
  0x59   :  { %p894_p2 = scmp.ne.s32.totalorder %s665_s30, %s893_s12  ;;  %p899_p4 = scmp.lt.s32.totalorder %s893_s12, %s893_s12 }
  0x5b   :  { %p900_p5 = por %p899_p4, %p898_p3 }
  0x5d   :  { %p901_p6 = pnand %p900_p5, %p894_p2 }
 0x10f   :  { %v229_v18 = vpop.f32.mrf.mxu0 }
 0x110   :  { %v230_v19 = vadd.f32 %v680_v17, %v229_v18 }
 0x111   :  { %v715_v20 = vpop.f32.mrf.mxu0 }
 0x112   :  { %v233_v21 = vmax.f32 %v230_v19, 0.0 }
 0x114   :  { %682 = vmatmul.mubr.msk.f32.vlgmr.msra.gmra.mxu1 %vm250_vm2, %v233_v21  ;;  %725 = vmatmul.mubr.msk.f32.vlgmr.msra.gmra.mxu0 %vm250_vm2, %v233_v21 }
 0x115   :  { %423 = vmatpush1.msra.mxu1 %v144_v22  ;;  %462 = vmatprep.mubr.f32.mxu1 %v955_v0 }
 0x116   :  { %424 = vmatprep.subr.mxu1 %v142_v23  ;;  %728 = vmatpush3.msra.mxu0 %v146_v24 }
 0x117   :  { %425 = vmatpush1.msra.mxu1 %v141_v25  ;;  %729 = vmatprep.subr.mxu0 %v955_v0 }
 0x118   :  { %426 = vmatprep.subr.mxu1 %v139_v26  ;;  %730 = vmatpush3.msra.mxu0 %v143_v27 }
 0x119   :  { %427 = vmatpush1.msra.mxu1 %v138_v28  ;;  %731 = vmatprep.subr.mxu0 %v955_v0 }
 0x11a   :  { %428 = vmatprep.subr.mxu1 %v136_v29  ;;  %732 = vmatpush3.msra.mxu0 %v140_v30 }
 0x11b   :  { %429 = vmatpush1.msra.mxu1 %v135_v31  ;;  %733 = vmatprep.subr.mxu0 %v955_v0 }
 0x11c   :  { %684 = vmatmul.mubr.msk.f32.vlgmr.msra.gmra.mxu1 %vm250_vm2, %v1062_v32  ;;  %734 = vmatpush3.msra.mxu0 %v137_v33 }
 0x11d   :  { %735 = vmatprep.mubr.msk.f32.mxu0 %vm956_vm0, %v955_v0  ;;  %738 = vmatprep.subr.mxu1 %v955_v0 }
 0x11e   :  { %736 = vmatmul.mubr.msk.f32.vlgmr.msra.gmra.mxu0 %vm250_vm2, %v1062_v32  ;;  %746 = vmatprep.mubr.msk.f32.mxu1 %vm956_vm0, %v955_v0 }
 0x11f   :  { %739 = vmatpush3.msra.mxu1 %v151_v34 }
 0x120   :  { %740 = vmatprep.subr.mxu1 %v955_v0 }
 0x121   :  { %741 = vmatpush3.msra.mxu1 %v150_v35 }
 0x122   :  { %742 = vmatprep.subr.mxu1 %v955_v0 }
 0x123   :  { %743 = vmatpush3.msra.mxu1 %v149_v36 }
 0x124   :  { %744 = vmatprep.subr.mxu1 %v955_v0  ;;  %v246_v0 = vrot.slane %v134_v41, %v245_v61 }
 0x125   :  { %745 = vmatpush3.msra.mxu1 %v148_v37 }
 0x1d4   :  { %v391_v42 = vpop.f32.mrf.mxu0  ;;  %v320_v43 = vpop.f32.mrf.mxu1 }
 0x1d5   :  { %v321_v48 = vadd.f32 %v320_v43, %v238_v45  ;;  %v392_v4 = vadd.f32 %v391_v42, %v246_v0 }
 0x1d6   :  { %v726_v44 = vpop.f32.mrf.mxu0  ;;  %v322_v47 = vpop.f32.mrf.mxu1 }
 0x1d7   :  { %v323_v56 = vadd.f32 %v322_v47, %v242_v50 }
 0x1dc   :  { %v464_v49 = vpop.f32.mrf.mxu1 }
 0x1dd   :  { %v539_v51 = vadd.f32 %v464_v49, %v321_v48 }
 0x1de   :  { %v535_v52 = vpop.f32.mrf.mxu0  ;;  %v466_v54 = vpop.f32.mrf.mxu1 }
 0x1df   :  { %v686_v53 = vmul.f32 -1.442695, %v539_v51  ;;  %v546_v57 = vadd.f32 %v466_v54, %v323_v56  ;;  %v559_v2 = vadd.f32 %v688_v63, %v535_v52 }
 0x1e0   :  { %v737_v55 = vpop.f32.mrf.mxu0 }
 0x1e1   :  { %763 = vpow2.f32 %v686_v53  ;;  %v687_v58 = vmul.f32 -1.442695, %v546_v57 }
 0x1e3   :  { %765 = vpow2.f32 %v687_v58 }
 0x1ee   :  { %v764_v59 = vpop.eup %763 }
 0x1ef   :  { %v543_v60 = vadd.f32 1.0, %v764_v59 }
 0x1f0   :  { %v766_v62 = vpop.eup %765 }
 0x1f1   :  { %767 = vrcp.f32 %v543_v60  ;;  %v550_v1 = vadd.f32 1.0, %v766_v62 }
 0x1f3   :  { %769 = vrcp.f32 %v550_v1 }
 0x1fe   :  { %v768_v3 = vpop.eup %767 }
 0x1ff   :  { %v560_v5 = vmul.f32 %v768_v3, %v559_v2 }
 0x200   :  { %v770_v7 = vpop.eup %769 }
 0x201   :  { %v561_v6 = vadd.f32 %v560_v5, %v392_v4  ;;  %v563_v8 = vsub.f32 1.0, %v770_v7  ;;  %v565_v11 = vmul.f32 %v770_v7, %v1062_v32 }
 0x203   :  { %771 = vtanh.f32 %v561_v6 }
 0x210   :  { %v772_v9 = vpop.eup %771 }
 0x211   :  { %v564_v10 = vmul.f32 %v772_v9, %v563_v8 }
 0x213   :  { %v566_v12 = vadd.f32 %v565_v11, %v564_v10 }
 0x215   :  { %747 = vmatmul.mubr.msk.f32.vlgmr.msra.gmra.mxu1 %vm250_vm2, %v566_v12  ;;  %647 = vst.msk [vmem:[#allocation14] sm:$0xff] %vm250_vm2, %v566_v12 }
 0x216   :  { %904 = shalt.err (!%p901_p6)
}
 0x217   :  { %667 = dma.vmem_to_hbm [thread:$0]  %s665_s30, 128, %s1107_s11, [#allocation15]   ;;  %v689_v13 = vld [vmem:[%s1105_s9] ss:$0 sm:$0xff] }
 0x218   :  { %s958_s16 = smov [#allocation13]  }
 0x219   :  { %s654_s4 = sshll.u32 %s958_s16, 4  ;;  %s655_s4 = int_to_ptr.vmem [resolvable:$true] %s654_s4 }
 0x21a   :  { %s913_s17 = scalar_lea.vmem %s655_s4, 128  ;;  %p918_p8 = scmp.lt.s32.totalorder %s655_s4, %s655_s4 }
 0x21b   :  { %p914_p7 = scmp.ne.s32.totalorder %s655_s4, %s913_s17  ;;  %p919_p9 = scmp.lt.s32.totalorder %s913_s17, %s913_s17 }
 0x21d   :  { %p920_p10 = por %p919_p9, %p918_p8 }
 0x21f   :  { %p921_p11 = pnand %p920_p10, %p914_p7 }
 0x2d5   :  { %v642_v14 = vpop.f32.mrf.mxu1 }
 0x2d6   :  { %v643_v15 = vadd.f32 %v689_v13, %v642_v14 }
 0x2d7   :  { %v748_v16 = vpop.f32.mrf.mxu1 }
 0x2d8   :  { %646 = vst [vmem:[#allocation13] sm:$0xff] %v643_v15 }
 0x2d9   :  { %924 = shalt.err (!%p921_p11)
}
 0x2da   :  { %657 = dma.vmem_to_hbm [thread:$0]  %s655_s4, 128, %s1106_s10, [#allocation4]  }
 0x2db   :  { %941 = dma.done.wait [#allocation4], 128  }
 0x2dc   :  { %942 = vsyncadd [#allocation4], 4294967168 }
 0x2dd   :  { %943 = dma.done.wait [#allocation15], 128  }
 0x2de   :  { %944 = vsyncadd [#allocation15], 4294967168 }
 0x2df   :  { %674 = vsyncpa [#allocation3], 1 }
 0x2e0   :  { %675 = vsyncpa [#allocation6], 1 }
 0x2e1   :  { %676 = vsyncpa [#allocation9], 1 }
 0x2e2   :  { %677 = vsyncpa [#allocation12], 1 }
 0x2e3   :  { %678 = vsyncpa [#allocation4], 1 }
 0x2e4   :  { %679 = vsyncpa [#allocation15], 1 }

</bundles_post_ra>
